<compile_context>
chip_gen: v5e
topology: v5e:2x2
jax: 0.10.0
libtpu: 0.0.40
codegen_flags: <defaults>
</compile_context>

<pallas_src>
import functools

import jax
import jax.numpy as jnp
import numpy as np
from jax import lax
from jax.experimental import pallas as pl
from jax.experimental.pallas import tpu as pltpu


# ---------------------------------------------------------------------------
# Plain-JAX glue: Point2Patch (FPS + kNN) and index gathers
# ---------------------------------------------------------------------------
def index_points(points, idx):
    """points [B, N, C], idx [B, ...] -> [B, ..., C]"""
    B = points.shape[0]
    batch_idx = jnp.arange(B).reshape((B,) + (1,) * (idx.ndim - 1))
    return points[batch_idx, idx]


def square_distance(src, dst):
    """src [B, S, 3], dst [B, N, 3] -> [B, S, N]"""
    diff = src[:, :, None, :] - dst[:, None, :, :]
    return jnp.sum(diff * diff, axis=-1)


def farthest_point_sample(xyz, npoint):
    """xyz [B, N, 3] -> idx [B, npoint] (first index is 0, like pointnet2)."""
    B, N, _ = xyz.shape

    def per_batch(pts):
        def body(carry, _):
            dists, last_idx = carry
            last = pts[last_idx]
            d = jnp.sum((pts - last) ** 2, axis=-1)
            dists = jnp.minimum(dists, d)
            nxt = jnp.argmax(dists).astype(jnp.int32)
            return (dists, nxt), nxt

        init = (jnp.full((N,), 1e10, jnp.float32), jnp.int32(0))
        _, rest = lax.scan(body, init, None, length=npoint - 1)
        return jnp.concatenate([jnp.zeros((1,), jnp.int32), rest])

    return jax.vmap(per_batch)(xyz)


def point2patch(num_patches, patch_size, xyz):
    fps_idx = farthest_point_sample(xyz, num_patches)          # [B, S]
    centroid_xyz = index_points(xyz, fps_idx)                  # [B, S, 3]
    dists = square_distance(centroid_xyz, xyz)                 # [B, S, N]
    knn_idx = jnp.argsort(dists, axis=-1)[:, :, :patch_size]   # [B, S, k]
    return centroid_xyz, fps_idx, knn_idx


# ---------------------------------------------------------------------------
# Pallas kernel: pointwise-MLP stack + K-major max/mean pooling + ResMLPBlock1D
# ---------------------------------------------------------------------------
def _patch_abstraction_kernel(Bt, S, K,
                              x_ref,
                              w1_ref, b1_ref,
                              w2_ref, b2_ref,
                              wr1_ref, br1_ref,
                              wr2_ref, br2_ref,
                              out_ref):
    rows = Bt * K * S
    x = x_ref[...].reshape(rows, x_ref.shape[-1]).astype(jnp.float32)

    # mlp_convs[0..1] (1x1 conv with BN folded into the weights) + ReLU.
    # TODO(synk): for production widths (channels >= 128) cast activations and
    # weights to bf16 here (keep preferred_element_type=f32) for full MXU rate.
    h = jnp.dot(x, w1_ref[...], preferred_element_type=jnp.float32)
    h = jnp.maximum(h + b1_ref[...], 0.0)
    h = jnp.dot(h, w2_ref[...], preferred_element_type=jnp.float32)
    h = jnp.maximum(h + b2_ref[...], 0.0)

    D = h.shape[-1]
    inv_k = 1.0 / K

    # K-major pooling: rows are ordered (b, k, s), so max/mean over the patch is
    # an unrolled elementwise chain over K slabs of shape (S, D) -- no XLU work.
    mx_list = []
    av_list = []
    for b in range(Bt):
        base = b * K * S
        mx = h[base:base + S, :]
        sm = mx
        for k in range(1, K):
            slab = h[base + k * S: base + (k + 1) * S, :]
            mx = jnp.maximum(mx, slab)
            sm = sm + slab
        mx_list.append(mx)
        av_list.append(sm * inv_k)
    mx_all = mx_list[0] if Bt == 1 else jnp.concatenate(mx_list, axis=0)
    av_all = av_list[0] if Bt == 1 else jnp.concatenate(av_list, axis=0)

    # ResMLPBlock1D(D, D): conv-bn-relu, conv-bn, + residual, relu (BN folded)
    y = jnp.dot(mx_all, wr1_ref[...], preferred_element_type=jnp.float32)
    y = jnp.maximum(y + br1_ref[...], 0.0)
    y = jnp.dot(y, wr2_ref[...], preferred_element_type=jnp.float32)
    y = y + br2_ref[...]
    mx_out = jnp.maximum(y + mx_all, 0.0)

    # Single packed output slab: [Bt, 2S, D] = [max rows | avg rows].
    out_ref[:, :S, :] = mx_out.reshape(Bt, S, D).astype(out_ref.dtype)
    out_ref[:, S:, :] = av_all.reshape(Bt, S, D).astype(out_ref.dtype)


def _choose_batch_tile(B, SK, cin, d1, d2, S, dout):
    """Pick how many batches to process per grid step."""
    target_rows = 2048                       # amortize ~0.35us per-step overhead
    bt = max(1, min(B, target_rows // max(SK, 1)))
    while B % bt:
        bt -= 1
    # Keep at least 2 grid steps when B allows it (v7x has 2 TensorCores).
    if bt == B and B > 1:
        bt = B // 2
        while B % bt:
            bt -= 1
    # Conservative per-step VMEM budget (double-buffered in/out + f32 activations),
    # sized for v7x's smaller VMEM (64 MiB physical / ~32 MiB scoped default).
    def step_bytes(t):
        rows = t * SK
        return 4 * (2 * rows * cin + rows * d1 + rows * d2 + 2 * t * 2 * S * dout)

    while bt > 1 and step_bytes(bt) > 24 * 1024 * 1024:
        bt -= 1
        while B % bt:
            bt -= 1
    return bt


def patch_abstraction_pallas(groups_kmajor, params, S, K, batch_tile=None):
    """groups_kmajor: [B, K*S, 2C] f32 (K-major row order)
       -> (max_patches [B, S, D], avg_patches [B, S, D])"""
    B, SK, Cin = groups_kmajor.shape
    assert SK == S * K
    D1 = params["w1"].shape[1]
    D = params["w2"].shape[1]

    Bt = (batch_tile if batch_tile is not None
          else _choose_batch_tile(B, SK, Cin, D1, D, S, D))
    assert B % Bt == 0

    kernel = functools.partial(_patch_abstraction_kernel, Bt, S, K)

    def full_spec(arr):
        nd = arr.ndim
        return pl.BlockSpec(arr.shape, lambda *_g, _n=nd: (0,) * _n)

    weight_order = ["w1", "b1", "w2", "b2", "wr1", "br1", "wr2", "br2"]
    weights = [params[n] for n in weight_order]

    out = pl.pallas_call(
        kernel,
        out_shape=jax.ShapeDtypeStruct((B, 2 * S, D), jnp.float32),
        grid_spec=pltpu.PrefetchScalarGridSpec(
            num_scalar_prefetch=0,
            grid=(B // Bt,),
            in_specs=[pl.BlockSpec((Bt, SK, Cin), lambda g: (g, 0, 0))]
                     + [full_spec(w) for w in weights],
            out_specs=pl.BlockSpec((Bt, 2 * S, D), lambda g: (g, 0, 0)),
        ),
        compiler_params=pltpu.CompilerParams(
            dimension_semantics=("parallel",)),
    )(groups_kmajor, *weights)

    return out[:, :S, :], out[:, S:, :]


# ---------------------------------------------------------------------------
# Parameter init (raw conv + BN params) and eval-mode BN folding
# ---------------------------------------------------------------------------
def init_raw_params(key, cin, mlp):
    D1, D2 = mlp
    dims = [("l1", cin, D1), ("l2", D1, D2), ("r1", D2, D2), ("r2", D2, D2)]
    keys = jax.random.split(key, 6 * len(dims))
    raw = {}
    for i, (name, ci, co) in enumerate(dims):
        kw, kb, kg, kbe, km, kv = keys[6 * i:6 * i + 6]
        raw[name] = dict(
            w=0.1 * jax.random.normal(kw, (ci, co), jnp.float32),
            b=0.1 * jax.random.normal(kb, (co,), jnp.float32),
            gamma=1.0 + 0.1 * jax.random.normal(kg, (co,), jnp.float32),
            beta=0.1 * jax.random.normal(kbe, (co,), jnp.float32),
            mean=0.1 * jax.random.normal(km, (co,), jnp.float32),
            var=jnp.abs(1.0 + 0.1 * jax.random.normal(kv, (co,), jnp.float32)),
        )
    return raw


def fold_bn_params(raw, eps=1e-5):
    """Fold eval-mode BatchNorm into the 1x1 convs: y = x @ w_eff + b_eff."""
    names = {"l1": ("w1", "b1"), "l2": ("w2", "b2"),
             "r1": ("wr1", "br1"), "r2": ("wr2", "br2")}
    out = {}
    for lname, (wn, bn) in names.items():
        layer = raw[lname]
        scale = layer["gamma"] / jnp.sqrt(layer["var"] + eps)
        out[wn] = layer["w"] * scale[None, :]
        out[bn] = ((layer["b"] - layer["mean"]) * scale + layer["beta"]).reshape(1, -1)
    return out


# ---------------------------------------------------------------------------
# Pure-JAX reference with UNFOLDED BN (validates both kernel and BN folding)
# ---------------------------------------------------------------------------
def reference_forward(groups, raw, eps=1e-5):
    def conv_bn(x, layer, relu):
        y = x @ layer["w"] + layer["b"]
        y = (y - layer["mean"]) / jnp.sqrt(layer["var"] + eps) * layer["gamma"] \
            + layer["beta"]
        return jnp.maximum(y, 0.0) if relu else y

    h = conv_bn(groups, raw["l1"], True)      # [B,S,K,D1]
    h = conv_bn(h, raw["l2"], True)           # [B,S,K,D2]
    mx = jnp.max(h, axis=2)
    av = jnp.mean(h, axis=2)
    y = conv_bn(mx, raw["r1"], True)
    y = conv_bn(y, raw["r2"], False)
    return jnp.maximum(y + mx, 0.0), av


# ---------------------------------------------------------------------------
if __name__ == "__main__":
    key = jax.random.PRNGKey(0)
    B, N, C = 2, 64, 4            # batch, points, feature channels
    S, K = 16, 8                  # num_patches, patch_size
    mlp = (16, 32)                # MLP widths; in_channel for convs = 2*C = 8
    in_channel = 2 * C

    k_xyz, k_feat, k_par = jax.random.split(key, 3)
    xyz = jax.random.normal(k_xyz, (B, N, 3), jnp.float32)
    feature = jax.random.normal(k_feat, (B, N, C), jnp.float32)
    raw_params = init_raw_params(k_par, in_channel, mlp)
    params = fold_bn_params(raw_params)

    # ---- Point2Patch + grouping (glue; data-dependent gather/sort) --------
    # TODO(synk): FPS + argsort-kNN are sequential sort/gather ops with no clean
    # Pallas TPU mapping at this size; kept in plain JAX.
    centroid_xyz, fps_idx, knn_idx = point2patch(S, K, xyz)
    centroid_feature = index_points(feature, fps_idx)              # [B,S,C]
    grouped_feature = index_points(feature, knn_idx)               # [B,S,K,C]
    grouped_norm = grouped_feature - centroid_feature[:, :, None, :]
    groups = jnp.concatenate(
        [jnp.broadcast_to(centroid_feature[:, :, None, :], grouped_feature.shape),
         grouped_norm], axis=-1)                                   # [B,S,K,2C]
    # K-major layout for the kernel: [B, K, S, 2C] -> [B, K*S, 2C]
    groups_kmajor = jnp.transpose(groups, (0, 2, 1, 3)).reshape(B, K * S, in_channel)

    # ---- Pallas kernel -----------------------------------------------------
    max_patches, avg_patches = patch_abstraction_pallas(groups_kmajor, params, S, K)
    centroid_xyz, max_patches, avg_patches = jax.block_until_ready(
        (centroid_xyz, max_patches, avg_patches))

    # ---- correctness check vs pure-JAX reference (unfolded BN) -------------
    ref_max, ref_avg = reference_forward(groups, raw_params)
    np.testing.assert_allclose(np.asarray(max_patches), np.asarray(ref_max),
                               rtol=2e-3, atol=2e-3)
    np.testing.assert_allclose(np.asarray(avg_patches), np.asarray(ref_avg),
                               rtol=2e-3, atol=2e-3)
    assert centroid_xyz.shape == (B, S, 3)
    assert max_patches.shape == (B, S, mlp[-1])
    assert avg_patches.shape == (B, S, mlp[-1])

    print("KERNEL_OK")
</pallas_src>

<mosaic_0001>
module attributes {stable_mosaic.version = 11 : i64} {
  func.func @_patch_abstraction_kernel(%arg0: i32, %arg1: memref<1x128x8xf32, #tpu.memory_space<vmem>>, %arg2: memref<8x16xf32, #tpu.memory_space<vmem>>, %arg3: memref<1x16xf32, #tpu.memory_space<vmem>>, %arg4: memref<16x32xf32, #tpu.memory_space<vmem>>, %arg5: memref<1x32xf32, #tpu.memory_space<vmem>>, %arg6: memref<32x32xf32, #tpu.memory_space<vmem>>, %arg7: memref<1x32xf32, #tpu.memory_space<vmem>>, %arg8: memref<32x32xf32, #tpu.memory_space<vmem>>, %arg9: memref<1x32xf32, #tpu.memory_space<vmem>>, %arg10: memref<1x32x32xf32, #tpu.memory_space<vmem>>) attributes {dimension_semantics = [#tpu.dimension_semantics<parallel>], iteration_bounds = array<i64: 2>, scalar_prefetch = 0 : i64, scratch_operands = 0 : i64, tpu.core_type = #tpu.core_type<tc>, window_params = [{transform_indices = @transform_0, window_bounds = array<i64: 1, 128, 8>}, {pipeline_mode = #tpu.pipeline_mode<synchronous>, transform_indices = @transform_1, window_bounds = array<i64: 8, 16>}, {pipeline_mode = #tpu.pipeline_mode<synchronous>, transform_indices = @transform_2, window_bounds = array<i64: 1, 16>}, {pipeline_mode = #tpu.pipeline_mode<synchronous>, transform_indices = @transform_3, window_bounds = array<i64: 16, 32>}, {pipeline_mode = #tpu.pipeline_mode<synchronous>, transform_indices = @transform_4, window_bounds = array<i64: 1, 32>}, {pipeline_mode = #tpu.pipeline_mode<synchronous>, transform_indices = @transform_5, window_bounds = array<i64: 32, 32>}, {pipeline_mode = #tpu.pipeline_mode<synchronous>, transform_indices = @transform_6, window_bounds = array<i64: 1, 32>}, {pipeline_mode = #tpu.pipeline_mode<synchronous>, transform_indices = @transform_7, window_bounds = array<i64: 32, 32>}, {pipeline_mode = #tpu.pipeline_mode<synchronous>, transform_indices = @transform_8, window_bounds = array<i64: 1, 32>}, {transform_indices = @transform_9, window_bounds = array<i64: 1, 32, 32>}]} {
    %c0 = arith.constant 0 : index
    %c0_0 = arith.constant 0 : index
    %c0_1 = arith.constant 0 : index
    %0 = vector.load %arg1[%c0, %c0_0, %c0_1] : memref<1x128x8xf32, #tpu.memory_space<vmem>>, vector<1x128x8xf32>
    %1 = vector.shape_cast %0 : vector<1x128x8xf32> to vector<128x8xf32>
    %c0_2 = arith.constant 0 : index
    %c0_3 = arith.constant 0 : index
    %2 = vector.load %arg2[%c0_2, %c0_3] : memref<8x16xf32, #tpu.memory_space<vmem>>, vector<8x16xf32>
    %cst = arith.constant dense<0.000000e+00> : vector<128x16xf32>
    %3 = tpu.matmul %1, %2, %cst {dimension_numbers = #tpu.dot_dimension_numbers<[1], [0], [0], [1], [0, 0, 1, 1], [], []>} : vector<128x8xf32>, vector<8x16xf32>, vector<128x16xf32> -> vector<128x16xf32>
    %c0_4 = arith.constant 0 : index
    %c0_5 = arith.constant 0 : index
    %4 = vector.load %arg3[%c0_4, %c0_5] : memref<1x16xf32, #tpu.memory_space<vmem>>, vector<1x16xf32>
    %5 = vector.broadcast %4 : vector<1x16xf32> to vector<128x16xf32>
    %6 = arith.addf %3, %5 : vector<128x16xf32>
    %cst_6 = arith.constant 0.000000e+00 : f32
    %7 = vector.broadcast %cst_6 : f32 to vector<128x16xf32>
    %8 = arith.maximumf %6, %7 : vector<128x16xf32>
    %c0_7 = arith.constant 0 : index
    %c0_8 = arith.constant 0 : index
    %9 = vector.load %arg4[%c0_7, %c0_8] : memref<16x32xf32, #tpu.memory_space<vmem>>, vector<16x32xf32>
    %cst_9 = arith.constant dense<0.000000e+00> : vector<128x32xf32>
    %10 = tpu.matmul %8, %9, %cst_9 {dimension_numbers = #tpu.dot_dimension_numbers<[1], [0], [0], [1], [0, 0, 1, 1], [], []>} : vector<128x16xf32>, vector<16x32xf32>, vector<128x32xf32> -> vector<128x32xf32>
    %c0_10 = arith.constant 0 : index
    %c0_11 = arith.constant 0 : index
    %11 = vector.load %arg5[%c0_10, %c0_11] : memref<1x32xf32, #tpu.memory_space<vmem>>, vector<1x32xf32>
    %12 = vector.broadcast %11 : vector<1x32xf32> to vector<128x32xf32>
    %13 = arith.addf %10, %12 : vector<128x32xf32>
    %cst_12 = arith.constant 0.000000e+00 : f32
    %14 = vector.broadcast %cst_12 : f32 to vector<128x32xf32>
    %15 = arith.maximumf %13, %14 : vector<128x32xf32>
    %16 = vector.extract_strided_slice %15 {offsets = [0, 0], sizes = [16, 32], strides = [1, 1]} : vector<128x32xf32> to vector<16x32xf32>
    %17 = vector.extract_strided_slice %15 {offsets = [16, 0], sizes = [16, 32], strides = [1, 1]} : vector<128x32xf32> to vector<16x32xf32>
    %18 = arith.maximumf %16, %17 : vector<16x32xf32>
    %19 = arith.addf %16, %17 : vector<16x32xf32>
    %20 = vector.extract_strided_slice %15 {offsets = [32, 0], sizes = [16, 32], strides = [1, 1]} : vector<128x32xf32> to vector<16x32xf32>
    %21 = arith.maximumf %18, %20 : vector<16x32xf32>
    %22 = arith.addf %19, %20 : vector<16x32xf32>
    %23 = vector.extract_strided_slice %15 {offsets = [48, 0], sizes = [16, 32], strides = [1, 1]} : vector<128x32xf32> to vector<16x32xf32>
    %24 = arith.maximumf %21, %23 : vector<16x32xf32>
    %25 = arith.addf %22, %23 : vector<16x32xf32>
    %26 = vector.extract_strided_slice %15 {offsets = [64, 0], sizes = [16, 32], strides = [1, 1]} : vector<128x32xf32> to vector<16x32xf32>
    %27 = arith.maximumf %24, %26 : vector<16x32xf32>
    %28 = arith.addf %25, %26 : vector<16x32xf32>
    %29 = vector.extract_strided_slice %15 {offsets = [80, 0], sizes = [16, 32], strides = [1, 1]} : vector<128x32xf32> to vector<16x32xf32>
    %30 = arith.maximumf %27, %29 : vector<16x32xf32>
    %31 = arith.addf %28, %29 : vector<16x32xf32>
    %32 = vector.extract_strided_slice %15 {offsets = [96, 0], sizes = [16, 32], strides = [1, 1]} : vector<128x32xf32> to vector<16x32xf32>
    %33 = arith.maximumf %30, %32 : vector<16x32xf32>
    %34 = arith.addf %31, %32 : vector<16x32xf32>
    %35 = vector.extract_strided_slice %15 {offsets = [112, 0], sizes = [16, 32], strides = [1, 1]} : vector<128x32xf32> to vector<16x32xf32>
    %36 = arith.maximumf %33, %35 : vector<16x32xf32>
    %37 = arith.addf %34, %35 : vector<16x32xf32>
    %cst_13 = arith.constant 1.250000e-01 : f32
    %38 = vector.broadcast %cst_13 : f32 to vector<16x32xf32>
    %39 = arith.mulf %37, %38 : vector<16x32xf32>
    %c0_14 = arith.constant 0 : index
    %c0_15 = arith.constant 0 : index
    %40 = vector.load %arg6[%c0_14, %c0_15] : memref<32x32xf32, #tpu.memory_space<vmem>>, vector<32x32xf32>
    %cst_16 = arith.constant dense<0.000000e+00> : vector<16x32xf32>
    %41 = tpu.matmul %36, %40, %cst_16 {dimension_numbers = #tpu.dot_dimension_numbers<[1], [0], [0], [1], [0, 0, 1, 1], [], []>} : vector<16x32xf32>, vector<32x32xf32>, vector<16x32xf32> -> vector<16x32xf32>
    %c0_17 = arith.constant 0 : index
    %c0_18 = arith.constant 0 : index
    %42 = vector.load %arg7[%c0_17, %c0_18] : memref<1x32xf32, #tpu.memory_space<vmem>>, vector<1x32xf32>
    %43 = vector.broadcast %42 : vector<1x32xf32> to vector<16x32xf32>
    %44 = arith.addf %41, %43 : vector<16x32xf32>
    %cst_19 = arith.constant 0.000000e+00 : f32
    %45 = vector.broadcast %cst_19 : f32 to vector<16x32xf32>
    %46 = arith.maximumf %44, %45 : vector<16x32xf32>
    %c0_20 = arith.constant 0 : index
    %c0_21 = arith.constant 0 : index
    %47 = vector.load %arg8[%c0_20, %c0_21] : memref<32x32xf32, #tpu.memory_space<vmem>>, vector<32x32xf32>
    %cst_22 = arith.constant dense<0.000000e+00> : vector<16x32xf32>
    %48 = tpu.matmul %46, %47, %cst_22 {dimension_numbers = #tpu.dot_dimension_numbers<[1], [0], [0], [1], [0, 0, 1, 1], [], []>} : vector<16x32xf32>, vector<32x32xf32>, vector<16x32xf32> -> vector<16x32xf32>
    %c0_23 = arith.constant 0 : index
    %c0_24 = arith.constant 0 : index
    %49 = vector.load %arg9[%c0_23, %c0_24] : memref<1x32xf32, #tpu.memory_space<vmem>>, vector<1x32xf32>
    %50 = vector.broadcast %49 : vector<1x32xf32> to vector<16x32xf32>
    %51 = arith.addf %48, %50 : vector<16x32xf32>
    %52 = arith.addf %51, %36 : vector<16x32xf32>
    %cst_25 = arith.constant 0.000000e+00 : f32
    %53 = vector.broadcast %cst_25 : f32 to vector<16x32xf32>
    %54 = arith.maximumf %52, %53 : vector<16x32xf32>
    %55 = vector.shape_cast %54 : vector<16x32xf32> to vector<1x16x32xf32>
    %c0_26 = arith.constant 0 : index
    %c0_27 = arith.constant 0 : index
    %c0_28 = arith.constant 0 : index
    %56 = vector.load %arg10[%c0_26, %c0_27, %c0_28] : memref<1x32x32xf32, #tpu.memory_space<vmem>>, vector<1x16x32xf32>
    tpu.vector_store %arg10[%c0_26, %c0_27, %c0_28], %55 {strides = array<i32>} : memref<1x32x32xf32, #tpu.memory_space<vmem>>, vector<1x16x32xf32>,
    %57 = vector.shape_cast %39 : vector<16x32xf32> to vector<1x16x32xf32>
    %c0_29 = arith.constant 0 : index
    %c16 = arith.constant 16 : index
    %c0_30 = arith.constant 0 : index
    %58 = vector.load %arg10[%c0_29, %c16, %c0_30] : memref<1x32x32xf32, #tpu.memory_space<vmem>>, vector<1x16x32xf32>
    tpu.vector_store %arg10[%c0_29, %c16, %c0_30], %57 {strides = array<i32>} : memref<1x32x32xf32, #tpu.memory_space<vmem>>, vector<1x16x32xf32>,
    return
  }
  func.func @transform_0(%arg0: i32) -> (i32, i32, i32) {
    %c0_i32 = arith.constant 0 : i32
    %c0_i32_0 = arith.constant 0 : i32
    %c0_i32_1 = arith.constant 0 : i32
    return %arg0, %c0_i32, %c0_i32_0 : i32, i32, i32
  }
  func.func @transform_1(%arg0: i32) -> (i32, i32) {
    %c0_i32 = arith.constant 0 : i32
    %c0_i32_0 = arith.constant 0 : i32
    %c0_i32_1 = arith.constant 0 : i32
    return %c0_i32, %c0_i32_0 : i32, i32
  }
  func.func @transform_2(%arg0: i32) -> (i32, i32) {
    %c0_i32 = arith.constant 0 : i32
    %c0_i32_0 = arith.constant 0 : i32
    %c0_i32_1 = arith.constant 0 : i32
    return %c0_i32, %c0_i32_0 : i32, i32
  }
  func.func @transform_3(%arg0: i32) -> (i32, i32) {
    %c0_i32 = arith.constant 0 : i32
    %c0_i32_0 = arith.constant 0 : i32
    %c0_i32_1 = arith.constant 0 : i32
    return %c0_i32, %c0_i32_0 : i32, i32
  }
  func.func @transform_4(%arg0: i32) -> (i32, i32) {
    %c0_i32 = arith.constant 0 : i32
    %c0_i32_0 = arith.constant 0 : i32
    %c0_i32_1 = arith.constant 0 : i32
    return %c0_i32, %c0_i32_0 : i32, i32
  }
  func.func @transform_5(%arg0: i32) -> (i32, i32) {
    %c0_i32 = arith.constant 0 : i32
    %c0_i32_0 = arith.constant 0 : i32
    %c0_i32_1 = arith.constant 0 : i32
    return %c0_i32, %c0_i32_0 : i32, i32
  }
  func.func @transform_6(%arg0: i32) -> (i32, i32) {
    %c0_i32 = arith.constant 0 : i32
    %c0_i32_0 = arith.constant 0 : i32
    %c0_i32_1 = arith.constant 0 : i32
    return %c0_i32, %c0_i32_0 : i32, i32
  }
  func.func @transform_7(%arg0: i32) -> (i32, i32) {
    %c0_i32 = arith.constant 0 : i32
    %c0_i32_0 = arith.constant 0 : i32
    %c0_i32_1 = arith.constant 0 : i32
    return %c0_i32, %c0_i32_0 : i32, i32
  }
  func.func @transform_8(%arg0: i32) -> (i32, i32) {
    %c0_i32 = arith.constant 0 : i32
    %c0_i32_0 = arith.constant 0 : i32
    %c0_i32_1 = arith.constant 0 : i32
    return %c0_i32, %c0_i32_0 : i32, i32
  }
  func.func @transform_9(%arg0: i32) -> (i32, i32, i32) {
    %c0_i32 = arith.constant 0 : i32
    %c0_i32_0 = arith.constant 0 : i32
    %c0_i32_1 = arith.constant 0 : i32
    return %arg0, %c0_i32, %c0_i32_0 : i32, i32, i32
  }
}

</mosaic_0001>

<bundles_post_ra>
// kernel: tpu_custom_call.1
= control target key start
LH: loop header
LB: loop body
LE: loop exit
PB: predicated region body
PF: predicated region fallthrough
CT: control target
= control target key end

     0   :  { %14 = vsyncpa [#allocation3], 0  ;;  %s1260_s0 = inlined_call_operand.vmem [shape: f32[2,128,8], index: 0, kind: input, shape index: {}]   ;;  %s1261_s1 = inlined_call_operand.vmem [shape: f32[8,16], index: 1, kind: input, shape index: {}]   ;;  %s1262_s2 = inlined_call_operand.vmem [shape: f32[1,16], index: 2, kind: input, shape index: {}]   ;;  %s1263_s3 = inlined_call_operand.vmem [shape: f32[16,32], index: 3, kind: input, shape index: {}]   ;;  %s1264_s4 = inlined_call_operand.vmem [shape: f32[1,32], index: 4, kind: input, shape index: {}]   ;;  %s1265_s5 = inlined_call_operand.vmem [shape: f32[32,32], index: 5, kind: input, shape index: {}]   ;;  %s1266_s6 = inlined_call_operand.vmem [shape: f32[1,32], index: 6, kind: input, shape index: {}]   ;;  %s1267_s7 = inlined_call_operand.vmem [shape: f32[32,32], index: 7, kind: input, shape index: {}]   ;;  %s1268_s8 = inlined_call_operand.vmem [shape: f32[1,32], index: 8, kind: input, shape index: {}]   ;;  %s1269_s9 = inlined_call_operand.hbm [shape: f32[2,32,32], index: 9, kind: output, shape index: {}]  }
   0x1   :  { %16 = vsyncpa [#allocation3 + $0x1], 0  ;;  %s1025_s30 = smov 0   ;;  %s1027_s10 = smov 0  }
   0x2   :  { %s1029_s11 = smov 0   ;;  %s1031_s12 = smov 0  }
   0x3 LB: > { %s1046_s13 = sadd.s32 4294967295, %s971_s12   ;;  %s811_s14 = sadd.s32 4294967294, %s971_s12   ;;  %s971_s12 = sphi %s1031_s12, %s1275_s12   ;;  %s967_s11 = sphi %s1029_s11, %s1274_s11   ;;  %s963_s10 = sphi %s1027_s10, %s1273_s10   ;;  %s959_s30 = sphi %s1025_s30, %s1272_s30  }
   0x4   : > { %s1050_s15 = sadd.s32 1, %s971_s12   ;;  %s223_s16 = sadd.s32 1, %s967_s11 }
   0x5   : > { %s220_s17 = ssub.s32 %s971_s12, %s1050_s15  ;;  %p233_p0 = scmp.ne.s32.totalorder %s967_s11, %s963_s10 }
   0x6   : > { %p221_p1 = scmp.eq.s32.totalorder %s220_s17, 0  ;;  %p234_p2 = scmp.eq.s32.totalorder %s1046_s13, 1 }
   0x7   : > { %p239_p3 = scmp.ne.s32.totalorder %s963_s10, %s959_s30  ;;  %p240_p4 = scmp.eq.s32.totalorder %s811_s14, 1 }
   0x8   : > { %s1061_s18 = scalar_select %p221_p1, %s967_s11, %s223_s16  }
   0x9   : > { %p1063_p5 = por %p234_p2, %p233_p0  ;;  %p1067_p6 = por %p240_p4, %p239_p3 }
   0xa   : > { %p814_p7 = scmp.ge.s32.totalorder %s971_s12, 1  ;;  %p290_p8 = scmp.lt.s32.totalorder %s971_s12, 3 }
   0xc   : > { %p291_p9 = pnand %p814_p7, %p290_p8 }
   0xd   : > { %p326_p10 = scmp.lt.s32.totalorder (!%p291_p9), %s1046_s13, 1  ;;  %s323_s28 = sand.u32 (!%p291_p9), 1, %s963_s10  }
   0xe   : > { %294 = sbr.rel (%p291_p9) target bundleno = 690 (0x2b2), region = 56  ;;  %s815_s29 = sshll.u32 (!%p291_p9), %s323_s28, 5 }
   0xf   : > { %s1206_s14 = scalar_lea.vmem (!%p291_p9), [#allocation2], %s815_s29 }
  0x13   : > { %v347_v0 = vld [vmem:[%s1261_s1] sm:$0xff]  ;;  %s327_s23 = scalar_select %p326_p10, %s1046_s13, 1  ;;  %vm352_vm0 = vcmask 64512   ;;  %v483_v17 = vld [vmem:[%s1263_s3 + $0x8] sm:$0xff]  ;;  %vm488_vm1 = vcmask 130048   ;;  %vm656_vm2 = vcmask 261120  }
  0x14   : > { %416 = vmatpush.msra.mxu0 %v347_v0  ;;  %861 = vmatpush.msra.mxu3 %v347_v0  ;;  %v482_v18 = vld [vmem:[%s1263_s3] sm:$0xff] }
  0x15   : > { %s859_s24 = sshll.u32 %s327_s23, 7  ;;  %551 = vmatpush.msra.mxu1 %v483_v17  ;;  %862 = vmatpush.msra.mxu2 %v483_v17  ;;  %v1124_v19 = vld [vmem:[%s1262_s2] ss:$0 sm:$0xff]  ;;  %s860_s23 = sshll.u32 %s1046_s13, 5 }
  0x16   : > { %s1081_s27 = scalar_lea.vmem %s1260_s0, %s859_s24  ;;  %s745_s26 = scalar_lea.hbm %s1269_s9, %s860_s23 }
  0x17   : > { %v331_v1 = vld [vmem:[%s1081_s27] sm:$0xff]  ;;  %v332_v2 = vld [vmem:[%s1081_s27 + $0x8] sm:$0xff]  ;;  %v333_v3 = vld [vmem:[%s1081_s27 + $0x10] sm:$0xff]  ;;  %552 = vmatpush.msra.mxu1 %v482_v18  ;;  %863 = vmatpush.msra.mxu2 %v482_v18  ;;  %s748_s29 = sshll.u32 %s745_s26, 4  ;;  %s734_s13 = scalar_lea.sflag [#allocation3], %s323_s28  ;;  %s749_s29 = int_to_ptr.hbm [resolvable:$true] %s748_s29 }
  0x18   : > { %818 = vmatmul.msk.f32.vlgmr.msra.gmra.mxu0 %vm352_vm0, %v331_v1  ;;  %v334_v4 = vld [vmem:[%s1081_s27 + $0x18] sm:$0xff]  ;;  %v335_v5 = vld [vmem:[%s1081_s27 + $0x20] sm:$0xff]  ;;  %v336_v6 = vld [vmem:[%s1081_s27 + $0x28] sm:$0xff]  ;;  %s923_s16 = sshra.s32 %s749_s29, 4  ;;  %s929_s23 = scalar_lea.hbm %s1269_s9, 64  ;;  %s924_s16 = int_to_ptr.hbm [resolvable:$true] %s923_s16 }
  0x19   : > { %v341_v7 = vld [vmem:[%s1081_s27 + $0x50] sm:$0xff]  ;;  %v342_v9 = vld [vmem:[%s1081_s27 + $0x58] sm:$0xff]  ;;  %v343_v11 = vld [vmem:[%s1081_s27 + $0x60] sm:$0xff]  ;;  %s925_s17 = scalar_lea.hbm %s924_s16, 32  ;;  %p930_p0 = scmp.lt.s32.totalorder %s924_s16, %s1269_s9 }
  0x1a   : > { %828 = vmatmul.msk.f32.vlgmr.msra.gmra.mxu3 %vm352_vm0, %v341_v7  ;;  %v337_v8 = vld [vmem:[%s1081_s27 + $0x30] sm:$0xff]  ;;  %v338_v10 = vld [vmem:[%s1081_s27 + $0x38] sm:$0xff]  ;;  %v339_v12 = vld [vmem:[%s1081_s27 + $0x40] sm:$0xff]  ;;  %p926_p11 = scmp.ne.s32.totalorder %s924_s16, %s925_s17  ;;  %p931_p1 = scmp.lt.s32.totalorder %s929_s23, %s925_s17 }
  0x1b   : > { %v344_v13 = vld [vmem:[%s1081_s27 + $0x68] sm:$0xff]  ;;  %v345_v15 = vld [vmem:[%s1081_s27 + $0x70] sm:$0xff]  ;;  %v346_v16 = vld [vmem:[%s1081_s27 + $0x78] sm:$0xff] }
  0x1c   : > { %v340_v14 = vld [vmem:[%s1081_s27 + $0x48] sm:$0xff]  ;;  %s746_s27 = sshll.u32 %s1206_s14, 4  ;;  %p927_p12 = pnand %p926_p11, %p1063_p5  ;;  %s747_s27 = int_to_ptr.vmem [resolvable:$true] %s746_s27 }
  0x1d   : > { %p932_p2 = por %p931_p1, %p930_p0 }
  0x1e   : > { %p928_p13 = pneg %p927_p12 }
  0x20   : > { %819 = vmatmul.msk.f32.gmra.mxu0 %vm352_vm0, %v332_v2  ;;  %p933_p3 = pnand %p932_p2, %p928_p13 }
  0x22   : > { %829 = vmatmul.msk.f32.gmra.mxu3 %vm352_vm0, %v342_v9 }
  0x28   : > { %820 = vmatmul.msk.f32.gmra.mxu0 %vm352_vm0, %v333_v3 }
  0x2a   : > { %830 = vmatmul.msk.f32.gmra.mxu3 %vm352_vm0, %v343_v11  ;;  %v649_v11 = vld [vmem:[%s1265_s5 + $0x8] sm:$0xff] }
  0x30   : > { %821 = vmatmul.msk.f32.gmra.mxu0 %vm352_vm0, %v334_v4 }
  0x32   : > { %831 = vmatmul.msk.f32.gmra.mxu3 %vm352_vm0, %v344_v13 }
  0x38   : > { %822 = vmatmul.msk.f32.gmra.mxu0 %vm352_vm0, %v335_v5 }
  0x3a   : > { %832 = vmatmul.msk.f32.gmra.mxu3 %vm352_vm0, %v345_v15 }
  0x40   : > { %823 = vmatmul.msk.f32.gmra.mxu0 %vm352_vm0, %v336_v6  ;;  %v651_v6 = vld [vmem:[%s1265_s5 + $0x18] sm:$0xff] }
  0x41   : > { %675 = vmatpush.msrb.mxu2 %v651_v6 }
  0x42   : > { %833 = vmatmul.msk.f32.gmra.mxu3 %vm352_vm0, %v346_v16 }
  0x48   : > { %824 = vmatmul.msk.f32.gmra.mxu0 %vm352_vm0, %v337_v8  ;;  %v650_v8 = vld [vmem:[%s1265_s5 + $0x10] sm:$0xff] }
  0x49   : > { %676 = vmatpush.msrb.mxu2 %v650_v8 }
  0x4b   : > { %677 = vmatpush.msrb.mxu2 %v649_v11 }
  0x50   : > { %825 = vmatmul.msk.f32.gmra.mxu0 %vm352_vm0, %v338_v10 }
  0x58   : > { %826 = vmatmul.msk.f32.gmra.mxu0 %vm352_vm0, %v339_v12 }
  0x60   : > { %827 = vmatmul.msk.f32.gmra.mxu0 %vm352_vm0, %v340_v14  ;;  %v648_v14 = vld [vmem:[%s1265_s5] sm:$0xff] }
  0x61   : > { %678 = vmatpush.msrb.mxu2 %v648_v14 }
  0x95   : > { %v418_v20 = vpop.f32.mrf.mxu0 }
  0x96   : > { %v419_v21 = vadd.f32 %v1124_v19, %v418_v20 }
  0x98   : > { %v466_v22 = vmax.f32 %v419_v21, 0.0 }
  0x9a   : > { %834 = vmatmul.msk.f32.vlgmr.msra.gmra.mxu1 %vm488_vm1, %v466_v22  ;;  %v691_v22 = vld [vmem:[%s1267_s7 + $0x18] sm:$0xff] }
  0x9b   : > { %714 = vmatpush.msrb.mxu3 %v691_v22 }
  0x9d   : > { %v421_v23 = vpop.f32.mrf.mxu0  ;;  %v448_v45 = vpop.f32.mrf.mxu3 }
  0x9e   : > { %v422_v24 = vadd.f32 %v1124_v19, %v421_v23  ;;  %v449_v52 = vadd.f32 %v1124_v19, %v448_v45  ;;  %v690_v23 = vld [vmem:[%s1267_s7 + $0x10] sm:$0xff] }
  0x9f   : > { %715 = vmatpush.msrb.mxu3 %v690_v23 }
  0xa0   : > { %v467_v25 = vmax.f32 %v422_v24, 0.0  ;;  %v476_v53 = vmax.f32 %v449_v52, 0.0 }
  0xa2   : > { %835 = vmatmul.msk.f32.gmra.mxu1 %vm488_vm1, %v467_v25 }
  0xa5   : > { %v424_v26 = vpop.f32.mrf.mxu0  ;;  %v451_v50 = vpop.f32.mrf.mxu3 }
  0xa6   : > { %v425_v27 = vadd.f32 %v1124_v19, %v424_v26  ;;  %v452_v55 = vadd.f32 %v1124_v19, %v451_v50  ;;  %v689_v26 = vld [vmem:[%s1267_s7 + $0x8] sm:$0xff] }
  0xa7   : > { %716 = vmatpush.msrb.mxu3 %v689_v26 }
  0xa8   : > { %v468_v28 = vmax.f32 %v425_v27, 0.0  ;;  %v477_v56 = vmax.f32 %v452_v55, 0.0 }
  0xaa   : > { %836 = vmatmul.msk.f32.gmra.mxu1 %vm488_vm1, %v468_v28 }
  0xad   : > { %v427_v29 = vpop.f32.mrf.mxu0  ;;  %v454_v54 = vpop.f32.mrf.mxu3 }
  0xae   : > { %v428_v30 = vadd.f32 %v1124_v19, %v427_v29  ;;  %v455_v57 = vadd.f32 %v1124_v19, %v454_v54 }
  0xb0   : > { %v469_v31 = vmax.f32 %v428_v30, 0.0  ;;  %v478_v59 = vmax.f32 %v455_v57, 0.0  ;;  %v688_v30 = vld [vmem:[%s1267_s7] sm:$0xff] }
  0xb1   : > { %717 = vmatpush.msrb.mxu3 %v688_v30 }
  0xb2   : > { %837 = vmatmul.msk.f32.gmra.mxu1 %vm488_vm1, %v469_v31 }
  0xb5   : > { %v430_v32 = vpop.f32.mrf.mxu0  ;;  %v457_v58 = vpop.f32.mrf.mxu3 }
  0xb6   : > { %v431_v33 = vadd.f32 %v1124_v19, %v430_v32  ;;  %v458_v60 = vadd.f32 %v1124_v19, %v457_v58 }
  0xb8   : > { %v470_v34 = vmax.f32 %v431_v33, 0.0  ;;  %v479_v62 = vmax.f32 %v458_v60, 0.0 }
  0xba   : > { %838 = vmatmul.msk.f32.gmra.mxu1 %vm488_vm1, %v470_v34 }
  0xbd   : > { %v433_v35 = vpop.f32.mrf.mxu0  ;;  %v460_v61 = vpop.f32.mrf.mxu3 }
  0xbe   : > { %v434_v36 = vadd.f32 %v1124_v19, %v433_v35  ;;  %v461_v63 = vadd.f32 %v1124_v19, %v460_v61 }
  0xc0   : > { %v471_v37 = vmax.f32 %v434_v36, 0.0  ;;  %v480_v0 = vmax.f32 %v461_v63, 0.0 }
  0xc2   : > { %839 = vmatmul.msk.f32.gmra.mxu1 %vm488_vm1, %v471_v37 }
  0xc5   : > { %v436_v38 = vpop.f32.mrf.mxu0  ;;  %v463_v1 = vpop.f32.mrf.mxu3 }
  0xc6   : > { %v437_v39 = vadd.f32 %v1124_v19, %v436_v38  ;;  %v464_v2 = vadd.f32 %v1124_v19, %v463_v1 }
  0xc8   : > { %v472_v40 = vmax.f32 %v437_v39, 0.0  ;;  %v481_v3 = vmax.f32 %v464_v2, 0.0 }
  0xca   : > { %840 = vmatmul.msk.f32.gmra.mxu1 %vm488_vm1, %v472_v40 }
  0xcd   : > { %v439_v41 = vpop.f32.mrf.mxu0 }
  0xce   : > { %v440_v42 = vadd.f32 %v1124_v19, %v439_v41 }
  0xd0   : > { %v473_v43 = vmax.f32 %v440_v42, 0.0 }
  0xd2   : > { %841 = vmatmul.msk.f32.gmra.mxu1 %vm488_vm1, %v473_v43 }
  0xd5   : > { %v442_v44 = vpop.f32.mrf.mxu0 }
  0xd6   : > { %v443_v46 = vadd.f32 %v1124_v19, %v442_v44 }
  0xd8   : > { %v474_v47 = vmax.f32 %v443_v46, 0.0 }
  0xda   : > { %842 = vmatmul.msk.f32.gmra.mxu1 %vm488_vm1, %v474_v47 }
  0xdd   : > { %v445_v48 = vpop.f32.mrf.mxu0 }
  0xde   : > { %v446_v49 = vadd.f32 %v1124_v19, %v445_v48  ;;  %v1173_v19 = vld [vmem:[%s1264_s4] ss:$0 sm:$0xff] }
  0xe0   : > { %v475_v51 = vmax.f32 %v446_v49, 0.0 }
  0xe2   : > { %843 = vmatmul.msk.f32.vlgmr.msra.gmra.mxu2 %vm488_vm1, %v475_v51 }
  0xea   : > { %844 = vmatmul.msk.f32.gmra.mxu2 %vm488_vm1, %v476_v53 }
  0xf2   : > { %845 = vmatmul.msk.f32.gmra.mxu2 %vm488_vm1, %v477_v56 }
  0xfa   : > { %846 = vmatmul.msk.f32.gmra.mxu2 %vm488_vm1, %v478_v59 }
 0x102   : > { %847 = vmatmul.msk.f32.gmra.mxu2 %vm488_vm1, %v479_v62 }
 0x10a   : > { %848 = vmatmul.msk.f32.gmra.mxu2 %vm488_vm1, %v480_v0 }
 0x112   : > { %849 = vmatmul.msk.f32.gmra.mxu2 %vm488_vm1, %v481_v3 }
 0x117   : > { %v554_v4 = vpop.f32.mrf.mxu1 }
 0x118   : > { %v555_v24 = vadd.f32 %v1173_v19, %v554_v4 }
 0x11a   : > { %v602_v31 = vmax.f32 %v555_v24, 0.0 }
 0x11f   : > { %v557_v5 = vpop.f32.mrf.mxu1 }
 0x120   : > { %v558_v40 = vadd.f32 %v1173_v19, %v557_v5 }
 0x122   : > { %v603_v51 = vmax.f32 %v558_v40, 0.0 }
 0x127   : > { %v560_v7 = vpop.f32.mrf.mxu1 }
 0x128   : > { %v561_v21 = vadd.f32 %v1173_v19, %v560_v7 }
 0x12a   : > { %v604_v28 = vmax.f32 %v561_v21, 0.0 }
 0x12c   : > { %v618_v36 = vmax.f32 %v602_v31, %v604_v28  ;;  %v620_v37 = vadd.f32 %v604_v28, %v602_v31  ;;  %v907_v28 = vld [vmem:[%s1266_s6] ss:$0 sm:$0xff] }
 0x12f   : > { %v563_v9 = vpop.f32.mrf.mxu1 }
 0x130   : > { %v564_v34 = vadd.f32 %v1173_v19, %v563_v9 }
 0x132   : > { %v605_v46 = vmax.f32 %v564_v34, 0.0  ;;  %v908_v34 = vld [vmem:[%s1268_s8] ss:$0 sm:$0xff] }
 0x134   : > { %v619_v57 = vmax.f32 %v603_v51, %v605_v46  ;;  %v621_v58 = vadd.f32 %v605_v46, %v603_v51 }
 0x137   : > { %v566_v10 = vpop.f32.mrf.mxu1 }
 0x138   : > { %v567_v25 = vadd.f32 %v1173_v19, %v566_v10 }
 0x13a   : > { %v606_v32 = vmax.f32 %v567_v25, 0.0 }
 0x13c   : > { %v622_v42 = vmax.f32 %v618_v36, %v606_v32  ;;  %v624_v43 = vadd.f32 %v620_v37, %v606_v32 }
 0x13f   : > { %v569_v12 = vpop.f32.mrf.mxu1 }
 0x140   : > { %v570_v41 = vadd.f32 %v1173_v19, %v569_v12 }
 0x142   : > { %v607_v52 = vmax.f32 %v570_v41, 0.0 }
 0x144   : > { %v623_v1 = vmax.f32 %v619_v57, %v607_v52  ;;  %v625_v2 = vadd.f32 %v621_v58, %v607_v52 }
 0x147   : > { %v572_v15 = vpop.f32.mrf.mxu1 }
 0x148   : > { %v573_v29 = vadd.f32 %v1173_v19, %v572_v15 }
 0x14a   : > { %v608_v38 = vmax.f32 %v573_v29, 0.0 }
 0x14c   : > { %v626_v48 = vmax.f32 %v622_v42, %v608_v38  ;;  %v628_v49 = vadd.f32 %v624_v43, %v608_v38 }
 0x14f   : > { %v575_v18 = vpop.f32.mrf.mxu1 }
 0x150   : > { %v576_v47 = vadd.f32 %v1173_v19, %v575_v18 }
 0x152   : > { %v609_v59 = vmax.f32 %v576_v47, 0.0 }
 0x154   : > { %v627_v8 = vmax.f32 %v623_v1, %v609_v59  ;;  %v629_v9 = vadd.f32 %v625_v2, %v609_v59 }
 0x157   : > { %v578_v27 = vpop.f32.mrf.mxu1 }
 0x158   : > { %v579_v33 = vadd.f32 %v1173_v19, %v578_v27 }
 0x15a   : > { %v610_v44 = vmax.f32 %v579_v33, 0.0 }
 0x15c   : > { %v630_v54 = vmax.f32 %v626_v48, %v610_v44  ;;  %v632_v55 = vadd.f32 %v628_v49, %v610_v44 }
 0x165   : > { %v581_v13 = vpop.f32.mrf.mxu2 }
 0x166   : > { %v582_v53 = vadd.f32 %v1173_v19, %v581_v13 }
 0x168   : > { %v611_v3 = vmax.f32 %v582_v53, 0.0 }
 0x16a   : > { %v631_v13 = vmax.f32 %v627_v8, %v611_v3  ;;  %v633_v14 = vadd.f32 %v629_v9, %v611_v3 }
 0x16d   : > { %v584_v16 = vpop.f32.mrf.mxu2 }
 0x16e   : > { %v585_v39 = vadd.f32 %v1173_v19, %v584_v16 }
 0x170   : > { %v612_v50 = vmax.f32 %v585_v39, 0.0 }
 0x172   : > { %v634_v61 = vmax.f32 %v630_v54, %v612_v50  ;;  %v636_v62 = vadd.f32 %v632_v55, %v612_v50 }
 0x175   : > { %v587_v17 = vpop.f32.mrf.mxu2 }
 0x176   : > { %v588_v63 = vadd.f32 %v1173_v19, %v587_v17 }
 0x178   : > { %v613_v10 = vmax.f32 %v588_v63, 0.0 }
 0x17a   : > { %v635_v18 = vmax.f32 %v631_v13, %v613_v10 }
 0x17d   : > { %v590_v20 = vpop.f32.mrf.mxu2 }
 0x17e   : > { %v591_v45 = vadd.f32 %v1173_v19, %v590_v20  ;;  %v637_v20 = vadd.f32 %v633_v14, %v613_v10 }
 0x180   : > { %v614_v56 = vmax.f32 %v591_v45, 0.0 }
 0x182   : > { %v638_v4 = vmax.f32 %v634_v61, %v614_v56  ;;  %v640_v5 = vadd.f32 %v636_v62, %v614_v56 }
 0x185   : > { %v593_v35 = vpop.f32.mrf.mxu2 }
 0x186   : > { %v594_v6 = vadd.f32 %v1173_v19, %v593_v35 }
 0x188   : > { %v615_v15 = vmax.f32 %v594_v6, 0.0 }
 0x18a   : > { %v639_v22 = vmax.f32 %v635_v18, %v615_v15  ;;  %v641_v23 = vadd.f32 %v637_v20, %v615_v15 }
 0x18d   : > { %v596_v60 = vpop.f32.mrf.mxu2 }
 0x18e   : > { %v597_v0 = vadd.f32 %v1173_v19, %v596_v60 }
 0x190   : > { %v616_v7 = vmax.f32 %v597_v0, 0.0 }
 0x192   : > { %v642_v11 = vmax.f32 %v638_v4, %v616_v7  ;;  %v644_v12 = vadd.f32 %v640_v5, %v616_v7 }
 0x194   : > { %v646_v16 = vmul.f32 0.125, %v644_v12  ;;  %850 = vmatmul.msk.f32.vlgmr.msrb.gmra.mxu2 %vm656_vm2, %v642_v11 }
 0x195   : > { %v599_v17 = vpop.f32.mrf.mxu2 }
 0x196   : > { %731 = vst.msk [vmem:[%s1206_s14 + $0x10] sm:$0xff] %vm656_vm2, %v646_v16  ;;  %v600_v21 = vadd.f32 %v1173_v19, %v599_v17 }
 0x198   : > { %v617_v24 = vmax.f32 %v600_v21, 0.0 }
 0x19a   : > { %v643_v25 = vmax.f32 %v639_v22, %v617_v24  ;;  %v645_v26 = vadd.f32 %v641_v23, %v617_v24 }
 0x19c   : > { %v647_v27 = vmul.f32 0.125, %v645_v26  ;;  %851 = vmatmul.msk.f32.gmra.mxu2 %vm656_vm2, %v643_v25 }
 0x19e   : > { %732 = vst.msk [vmem:[%s1206_s14 + $0x18] sm:$0xff] %vm656_vm2, %v647_v27 }
 0x217   : > { %v680_v29 = vpop.f32.mrf.mxu2 }
 0x218   : > { %v681_v30 = vadd.f32 %v907_v28, %v680_v29 }
 0x21a   : > { %v686_v31 = vmax.f32 %v681_v30, 0.0 }
 0x21c   : > { %852 = vmatmul.msk.f32.vlgmr.msrb.gmra.mxu3 %vm656_vm2, %v686_v31 }
 0x21f   : > { %v683_v19 = vpop.f32.mrf.mxu2 }
 0x220   : > { %v684_v32 = vadd.f32 %v907_v28, %v683_v19 }
 0x222   : > { %v687_v33 = vmax.f32 %v684_v32, 0.0 }
 0x224   : > { %853 = vmatmul.msk.f32.gmra.mxu3 %vm656_vm2, %v687_v33 }
 0x29f   : > { %v719_v35 = vpop.f32.mrf.mxu3 }
 0x2a0   : > { %v720_v36 = vadd.f32 %v908_v34, %v719_v35 }
 0x2a2   : > { %v725_v37 = vadd.f32 %v720_v36, %v642_v11 }
 0x2a4   : > { %v727_v38 = vmax.f32 %v725_v37, 0.0 }
 0x2a6   : > { %729 = vst.msk [vmem:[%s1206_s14] sm:$0xff] %vm656_vm2, %v727_v38 }
 0x2a7   : > { %v722_v39 = vpop.f32.mrf.mxu3 }
 0x2a8   : > { %v723_v40 = vadd.f32 %v908_v34, %v722_v39 }
 0x2aa   : > { %v726_v41 = vadd.f32 %v723_v40, %v643_v25 }
 0x2ac   : > { %v728_v42 = vmax.f32 %v726_v41, 0.0 }
 0x2ae   : > { %730 = vst.msk [vmem:[%s1206_s14 + $0x8] sm:$0xff] %vm656_vm2, %v728_v42 }
 0x2af   : > { %936 = shalt.err (!%p933_p3)
}
 0x2b0   : > { %s973_s28 = smov 128   ;;  %s974_s14 = smov 8  }
 0x2b1   : > { %864 = dma.vmem_to_hbm [thread:$0]  (%p1063_p5), %s747_s27, 512, %s749_s29, %s734_s13, %s973_s28, %s973_s28, %s974_s14  }
 0x2b2 PF: > { %p870_p4 = scmp.ge.s32.totalorder %s971_s12, 2  ;;  %s763_s26 = sand.u32 1, %s959_s30  }
 0x2b3   : > { %s764_s21 = scalar_lea.sflag [#allocation3], %s763_s26 }
 0x2b4   : > { %p867_p7 = pnand %p870_p4, %p1067_p6 }
 0x2b6   : > { %p868_p8 = pneg %p867_p7 }
 0x2b8   : > { %954 = dma.done.wait (%p868_p8), %s764_s21, 512  }
 0x2b9   : > { %956 = vsyncadd (%p868_p8), %s764_s21, 4294966784  ;;  %p19_p9 = scmp.ge.s32.totalorder %s1050_s15, 4   ;;  %s1272_s30 = smov %s963_s10 }
 0x2ba   : > { %s1273_s10 = smov %s967_s11  ;;  %s1274_s11 = smov %s1061_s18 }
 0x2bb   : > { %s1275_s12 = smov %s1050_s15  ;;  %21 = sbr.rel (!%p19_p9) target bundleno = 3 (0x3), region = 91 }
 0x2c0   :  { %770 = vsyncpa [#allocation3], 1 }
 0x2c1   :  { %772 = vsyncpa [#allocation3 + $0x1], 1 }

</bundles_post_ra>
